<compile_context>
chip_gen: v5e
topology: v5e:2x2
jax: 0.10.0
libtpu: 0.0.40
codegen_flags: <defaults>
</compile_context>

<pallas_src>
import functools

import jax
import jax.numpy as jnp
from jax.experimental import pallas as pl
from jax.experimental.pallas import tpu as pltpu

_LANES = 128
_ROW_ALIGN = 32          # covers f32 (8,128), bf16 (16,128), int8/bool (32,128) tiling
_MAX_BLOCK_ROWS = 4096   # 4096*128*4B = 2 MiB per f32 stream per buffer


def _fold_rows(x, rows):
    """(rows, 128) -> (8, 128) partial sum with a two-stage fold for ILP."""
    if rows > 64 and rows % 64 == 0:
        x = x.reshape(rows // 64, 64, _LANES).sum(axis=0)
        rows = 64
    if rows > 8:
        x = x.reshape(rows // 8, 8, _LANES).sum(axis=0)
    return x


def _bt_partial_kernel(s0_ref, s1_ref, mu_ref, part_ref, *,
                       block_rows, rows_total, needs_mask):
    # Upcast in-register; inputs may be bf16 / int8 / bool-as-int8 in HBM.
    s0 = s0_ref[...].astype(jnp.float32)
    s1 = s1_ref[...].astype(jnp.float32)
    mu = mu_ref[...].astype(jnp.float32)

    diff = s1 - s0
    # Stable softplus pair sharing one exp + one log1p:
    #   softplus(d)  = relu(d)  + log1p(exp(-|d|))
    #   softplus(-d) = relu(-d) + log1p(exp(-|d|))
    t = jnp.log1p(jnp.exp(-jnp.abs(diff)))
    sp_pos = jnp.maximum(diff, 0.0) + t      # softplus(diff)
    sp_neg = jnp.maximum(-diff, 0.0) + t     # softplus(-diff)
    # log(sigmoid(diff)) / log(1 - sigmoid(diff)) with PyTorch BCELoss -100 clamp.
    log_p = jnp.maximum(-sp_neg, -100.0)
    log_1mp = jnp.maximum(-sp_pos, -100.0)
    per_elem = -(log_1mp + mu * (log_p - log_1mp))

    if needs_mask:
        g = pl.program_id(0)
        last = pl.num_programs(0) - 1

        @pl.when(g != last)
        def _full():
            part_ref[0] = _fold_rows(per_elem, block_rows)

        @pl.when(g == last)
        def _masked():
            # Only the last block is partial; rows past rows_total hold garbage
            # (Pallas partial-block padding) and are discarded AFTER all math.
            valid = rows_total - g * block_rows
            row = jax.lax.broadcasted_iota(jnp.int32, per_elem.shape, 0)
            masked = jnp.where(row < valid, per_elem, 0.0)
            part_ref[0] = _fold_rows(masked, block_rows)
    else:
        part_ref[0] = _fold_rows(per_elem, block_rows)


def _loss_sum_jnp(s0, s1, mu):
    """Same clamped BCE(sigmoid) math for the tiny (<128 elem) ragged tail."""
    d = s1.astype(jnp.float32) - s0.astype(jnp.float32)
    t = jnp.log1p(jnp.exp(-jnp.abs(d)))
    sp_pos = jnp.maximum(d, 0.0) + t
    sp_neg = jnp.maximum(-d, 0.0) + t
    log_p = jnp.maximum(-sp_neg, -100.0)
    log_1mp = jnp.maximum(-sp_pos, -100.0)
    mu = mu.astype(jnp.float32)
    return -jnp.sum(log_1mp + mu * (log_p - log_1mp))


def bradley_terry_loss(score_0, score_1, mu, *, max_block_rows=_MAX_BLOCK_ROWS):
    """prob = sigmoid(score_1 - score_0).squeeze(); return nn.BCELoss()(prob, mu)."""
    s0 = jnp.reshape(score_0, (-1,))
    s1 = jnp.reshape(score_1, (-1,))
    mu_f = jnp.reshape(mu, (-1,))

    # Scores: keep floating dtypes native (upcast in-register); int scores -> f32.
    if not jnp.issubdtype(s0.dtype, jnp.floating):
        s0 = s0.astype(jnp.float32)
    if not jnp.issubdtype(s1.dtype, jnp.floating):
        s1 = s1.astype(jnp.float32)
    # Targets: keep native width in HBM (bf16/f32/int8); only bool -> int8.
    if mu_f.dtype == jnp.bool_:
        mu_f = mu_f.astype(jnp.int8)

    n = s0.shape[0]
    assert s1.shape[0] == n and mu_f.shape[0] == n, "shape mismatch"
    rows_total = n // _LANES
    n_main = rows_total * _LANES
    rem = n - n_main

    total = jnp.float32(0.0)

    if rows_total > 0:
        block_rows = min(rows_total, max_block_rows)
        block_rows = -(-block_rows // _ROW_ALIGN) * _ROW_ALIGN   # round up to 32
        grid = pl.cdiv(rows_total, block_rows)
        needs_mask = (rows_total % block_rows) != 0

        def to_slab(x):
            # rem == 0: pure bitcast (no copy).  rem != 0: one prefix-slice copy;
            # no full-stream jnp.pad and no rounding up to a block multiple.
            x_main = x if rem == 0 else x[:n_main]
            return x_main.reshape(rows_total, _LANES)

        s0_m, s1_m, mu_m = to_slab(s0), to_slab(s1), to_slab(mu_f)

        in_spec = pl.BlockSpec((block_rows, _LANES), lambda g: (g, 0))
        kernel = functools.partial(
            _bt_partial_kernel,
            block_rows=block_rows,
            rows_total=rows_total,
            needs_mask=needs_mask,
        )

        bytes_accessed = (
            s0_m.size * s0_m.dtype.itemsize
            + s1_m.size * s1_m.dtype.itemsize
            + mu_m.size * mu_m.dtype.itemsize
            + grid * 8 * _LANES * 4
        )

        partials = pl.pallas_call(
            kernel,
            out_shape=jax.ShapeDtypeStruct((grid, 8, _LANES), jnp.float32),
            grid=(grid,),
            in_specs=[in_spec, in_spec, in_spec],
            out_specs=pl.BlockSpec((1, 8, _LANES), lambda g: (g, 0, 0)),
            compiler_params=pltpu.CompilerParams(
                dimension_semantics=("parallel",),   # per-block partials: TC-shardable
                vmem_limit_bytes=32 * 1024 * 1024,
            ),
            cost_estimate=pl.CostEstimate(
                flops=16 * n_main,
                transcendentals=2 * n_main,
                bytes_accessed=bytes_accessed,
            ),
        )(s0_m, s1_m, mu_m)

        total = total + jnp.sum(partials, dtype=jnp.float32)

    if rem:
        total = total + _loss_sum_jnp(s0[n_main:], s1[n_main:], mu_f[n_main:])

    return total / jnp.float32(n)


def _reference(score_0, score_1, mu):
    # Mirrors PyTorch: sigmoid -> BCELoss (log clamped at -100), mean reduction.
    d = (jnp.reshape(score_1, (-1,)).astype(jnp.float32)
         - jnp.reshape(score_0, (-1,)).astype(jnp.float32))
    p = jax.nn.sigmoid(d)
    log_p = jnp.maximum(jnp.log(p), -100.0)
    log_1mp = jnp.maximum(jnp.log(1.0 - p), -100.0)
    mu = jnp.reshape(mu, (-1,)).astype(jnp.float32)
    return jnp.mean(-(mu * log_p + (1.0 - mu) * log_1mp))


if __name__ == "__main__":
    key = jax.random.PRNGKey(0)
    k0, k1, k2 = jax.random.split(key, 3)

    # Module has no learnable parameters; BCELoss(sigmoid(diff), mu) only.
    # B=1000 exercises: kernel path (7 lane-rows), masked partial row-block,
    # and the 104-element plain-JAX lane tail.
    B = 1000
    score_0 = jax.random.normal(k0, (B, 1), dtype=jnp.float32)
    score_1 = jax.random.normal(k1, (B, 1), dtype=jnp.float32)
    mu = (jax.random.uniform(k2, (B,)) > 0.5).astype(jnp.float32)

    loss = bradley_terry_loss(score_0, score_1, mu)
    jax.block_until_ready(loss)
    ref = _reference(score_0, score_1, mu)
    assert jnp.allclose(loss, ref, atol=1e-5, rtol=1e-5), (loss, ref)

    # Aligned case (no mask, no tail, free bitcast into the kernel).
    B2 = 4096
    s0b = jax.random.normal(k0, (B2, 1), dtype=jnp.float32)
    s1b = jax.random.normal(k1, (B2, 1), dtype=jnp.float32)
    mub = (jax.random.uniform(k2, (B2,)) > 0.5).astype(jnp.float32)
    l2 = bradley_terry_loss(s0b, s1b, mub)
    jax.block_until_ready(l2)
    assert jnp.allclose(l2, _reference(s0b, s1b, mub), atol=1e-5, rtol=1e-5), l2

    # Multi-block grid with masked partial last block + lane tail
    # (small block override purely to exercise the grid>1 path at small N).
    B3 = 12837
    s0c = jax.random.normal(k0, (B3, 1), dtype=jnp.float32)
    s1c = jax.random.normal(k1, (B3, 1), dtype=jnp.float32)
    muc = (jax.random.uniform(k2, (B3,)) > 0.5).astype(jnp.float32)
    l3 = bradley_terry_loss(s0c, s1c, muc, max_block_rows=32)
    jax.block_until_ready(l3)
    assert jnp.allclose(l3, _reference(s0c, s1c, muc), atol=1e-5, rtol=1e-5), l3

    print("KERNEL_OK")
</pallas_src>

<mosaic_0001>
module attributes {stable_mosaic.version = 11 : i64} {
  func.func @_bt_partial_kernel(%arg0: i32, %arg1: memref<32x128xf32, #tpu.memory_space<vmem>>, %arg2: memref<32x128xf32, #tpu.memory_space<vmem>>, %arg3: memref<32x128xf32, #tpu.memory_space<vmem>>, %arg4: memref<1x8x128xf32, #tpu.memory_space<vmem>>) attributes {dimension_semantics = [#tpu.dimension_semantics<parallel>], iteration_bounds = array<i64: 1>, scalar_prefetch = 0 : i64, scratch_operands = 0 : i64, tpu.core_type = #tpu.core_type<tc>, window_params = [{transform_indices = @transform_0, window_bounds = array<i64: 32, 128>}, {transform_indices = @transform_1, window_bounds = array<i64: 32, 128>}, {transform_indices = @transform_2, window_bounds = array<i64: 32, 128>}, {transform_indices = @transform_3, window_bounds = array<i64: 1, 8, 128>}]} {
    %c0 = arith.constant 0 : index
    %c0_0 = arith.constant 0 : index
    %0 = vector.load %arg1[%c0, %c0_0] : memref<32x128xf32, #tpu.memory_space<vmem>>, vector<32x128xf32>
    %c0_1 = arith.constant 0 : index
    %c0_2 = arith.constant 0 : index
    %1 = vector.load %arg2[%c0_1, %c0_2] : memref<32x128xf32, #tpu.memory_space<vmem>>, vector<32x128xf32>
    %c0_3 = arith.constant 0 : index
    %c0_4 = arith.constant 0 : index
    %2 = vector.load %arg3[%c0_3, %c0_4] : memref<32x128xf32, #tpu.memory_space<vmem>>, vector<32x128xf32>
    %3 = arith.subf %1, %0 : vector<32x128xf32>
    %4 = math.absf %3 : vector<32x128xf32>
    %cst = arith.constant 0.000000e+00 : f32
    %5 = vector.broadcast %cst : f32 to vector<32x128xf32>
    %6 = arith.subf %5, %4 : vector<32x128xf32>
    %7 = math.exp %6 : vector<32x128xf32>
    %8 = math.log1p %7 : vector<32x128xf32>
    %cst_5 = arith.constant 0.000000e+00 : f32
    %9 = vector.broadcast %cst_5 : f32 to vector<32x128xf32>
    %10 = arith.maximumf %3, %9 : vector<32x128xf32>
    %11 = arith.addf %10, %8 : vector<32x128xf32>
    %cst_6 = arith.constant 0.000000e+00 : f32
    %12 = vector.broadcast %cst_6 : f32 to vector<32x128xf32>
    %13 = arith.subf %12, %3 : vector<32x128xf32>
    %cst_7 = arith.constant 0.000000e+00 : f32
    %14 = vector.broadcast %cst_7 : f32 to vector<32x128xf32>
    %15 = arith.maximumf %13, %14 : vector<32x128xf32>
    %16 = arith.addf %15, %8 : vector<32x128xf32>
    %cst_8 = arith.constant 0.000000e+00 : f32
    %17 = vector.broadcast %cst_8 : f32 to vector<32x128xf32>
    %18 = arith.subf %17, %16 : vector<32x128xf32>
    %cst_9 = arith.constant -1.000000e+02 : f32
    %19 = vector.broadcast %cst_9 : f32 to vector<32x128xf32>
    %20 = arith.maximumf %18, %19 : vector<32x128xf32>
    %cst_10 = arith.constant 0.000000e+00 : f32
    %21 = vector.broadcast %cst_10 : f32 to vector<32x128xf32>
    %22 = arith.subf %21, %11 : vector<32x128xf32>
    %cst_11 = arith.constant -1.000000e+02 : f32
    %23 = vector.broadcast %cst_11 : f32 to vector<32x128xf32>
    %24 = arith.maximumf %22, %23 : vector<32x128xf32>
    %25 = arith.subf %20, %24 : vector<32x128xf32>
    %26 = arith.mulf %2, %25 : vector<32x128xf32>
    %27 = arith.addf %24, %26 : vector<32x128xf32>
    %cst_12 = arith.constant 0.000000e+00 : f32
    %28 = vector.broadcast %cst_12 : f32 to vector<32x128xf32>
    %29 = arith.subf %28, %27 : vector<32x128xf32>
    %c0_i32 = arith.constant 0 : i32
    %30 = arith.cmpi ne, %arg0, %c0_i32 : i32
    %31 = arith.extui %30 : i1 to i32
    %c0_i32_13 = arith.constant 0 : i32
    %32 = arith.cmpi ne, %31, %c0_i32_13 : i32
    scf.if %32 {
      %36 = vector.shape_cast %29 : vector<32x128xf32> to vector<4x8x128xf32>
      %cst_16 = arith.constant dense<0.000000e+00> : vector<8x128xf32>
      %37 = vector.multi_reduction <add>, %36, %cst_16 [0] : vector<4x8x128xf32> to vector<8x128xf32>
      %c0_17 = arith.constant 0 : index
      %c0_18 = arith.constant 0 : index
      %c0_19 = arith.constant 0 : index
      %38 = vector.load %arg4[%c0_17, %c0_18, %c0_19] : memref<1x8x128xf32, #tpu.memory_space<vmem>>, vector<1x8x128xf32>
      %39 = vector.shape_cast %38 : vector<1x8x128xf32> to vector<8x128xf32>
      %40 = vector.shape_cast %37 : vector<8x128xf32> to vector<1x8x128xf32>
      tpu.vector_store %arg4[%c0_17, %c0_18, %c0_19], %40 {strides = array<i32>} : memref<1x8x128xf32, #tpu.memory_space<vmem>>, vector<1x8x128xf32>,
    } else {
    }
    %c0_i32_14 = arith.constant 0 : i32
    %33 = arith.cmpi eq, %arg0, %c0_i32_14 : i32
    %34 = arith.extui %33 : i1 to i32
    %c0_i32_15 = arith.constant 0 : i32
    %35 = arith.cmpi ne, %34, %c0_i32_15 : i32
    scf.if %35 {
      %c32_i32 = arith.constant 32 : i32
      %36 = arith.muli %arg0, %c32_i32 : i32
      %c7_i32 = arith.constant 7 : i32
      %37 = arith.subi %c7_i32, %36 : i32
      %38 = tpu.iota {dimensions = array<i32: 0>} : vector<32x128xi32>
      %39 = vector.broadcast %37 : i32 to vector<32x128xi32>
      %40 = arith.cmpi slt, %38, %39 : vector<32x128xi32>
      %cst_16 = arith.constant 0.000000e+00 : f32
      %41 = vector.broadcast %cst_16 : f32 to vector<32x128xf32>
      %42 = arith.select %40, %29, %41 : vector<32x128xi1>, vector<32x128xf32>
      %43 = vector.shape_cast %42 : vector<32x128xf32> to vector<4x8x128xf32>
      %cst_17 = arith.constant dense<0.000000e+00> : vector<8x128xf32>
      %44 = vector.multi_reduction <add>, %43, %cst_17 [0] : vector<4x8x128xf32> to vector<8x128xf32>
      %c0_18 = arith.constant 0 : index
      %c0_19 = arith.constant 0 : index
      %c0_20 = arith.constant 0 : index
      %45 = vector.load %arg4[%c0_18, %c0_19, %c0_20] : memref<1x8x128xf32, #tpu.memory_space<vmem>>, vector<1x8x128xf32>
      %46 = vector.shape_cast %45 : vector<1x8x128xf32> to vector<8x128xf32>
      %47 = vector.shape_cast %44 : vector<8x128xf32> to vector<1x8x128xf32>
      tpu.vector_store %arg4[%c0_18, %c0_19, %c0_20], %47 {strides = array<i32>} : memref<1x8x128xf32, #tpu.memory_space<vmem>>, vector<1x8x128xf32>,
    } else {
    }
    return
  }
  func.func @transform_0(%arg0: i32) -> (i32, i32) {
    %c0_i32 = arith.constant 0 : i32
    %c0_i32_0 = arith.constant 0 : i32
    return %arg0, %c0_i32 : i32, i32
  }
  func.func @transform_1(%arg0: i32) -> (i32, i32) {
    %c0_i32 = arith.constant 0 : i32
    %c0_i32_0 = arith.constant 0 : i32
    return %arg0, %c0_i32 : i32, i32
  }
  func.func @transform_2(%arg0: i32) -> (i32, i32) {
    %c0_i32 = arith.constant 0 : i32
    %c0_i32_0 = arith.constant 0 : i32
    return %arg0, %c0_i32 : i32, i32
  }
  func.func @transform_3(%arg0: i32) -> (i32, i32, i32) {
    %c0_i32 = arith.constant 0 : i32
    %c0_i32_0 = arith.constant 0 : i32
    %c0_i32_1 = arith.constant 0 : i32
    return %arg0, %c0_i32, %c0_i32_0 : i32, i32, i32
  }
}

</mosaic_0001>

<bundles_post_ra>
// kernel: tpu_custom_call.1
= control target key start
LH: loop header
LB: loop body
LE: loop exit
PB: predicated region body
PF: predicated region fallthrough
CT: control target
= control target key end

     0   :  { %8 = vsyncpa [#allocation3], 0  ;;  %s382_s0 = inlined_call_operand.hbm [shape: f32[7,128], index: 0, kind: input, shape index: {}]   ;;  %s383_s1 = inlined_call_operand.hbm [shape: f32[7,128], index: 1, kind: input, shape index: {}]   ;;  %s384_s2 = inlined_call_operand.hbm [shape: f32[7,128], index: 2, kind: input, shape index: {}]   ;;  %s385_s3 = inlined_call_operand.hbm [shape: f32[1,8,128], index: 3, kind: output, shape index: {}]  }
   0x1   :  { %9 = vsyncpa [#allocation6], 0 }
   0x2   :  { %10 = vsyncpa [#allocation4], 0 }
   0x3   :  { %14 = vsyncadd [#allocation3], 384  ;;  %s15_s14 = sshll.u32 %s382_s0, 4  ;;  %s344_s15 = smov [#allocation2]   ;;  %s16_s14 = int_to_ptr.hbm [resolvable:$true] %s15_s14 }
   0x4   :  { %s17_s16 = sshll.u32 %s344_s15, 4  ;;  %s345_s17 = smov 128   ;;  %s18_s16 = int_to_ptr.vmem [resolvable:$true] %s17_s16 }
   0x5   :  { %s346_s18 = smov 8  }
   0x6   :  { %23 = dma.hbm_to_vmem [thread:$0]  %s16_s14, 128, %s18_s16, [#allocation3], %s345_s17, %s345_s17, %s346_s18  }
   0x7   :  { %27 = vsyncadd [#allocation6], 384  ;;  %s28_s21 = sshll.u32 %s383_s1, 4  ;;  %s347_s22 = smov [#allocation5]   ;;  %s29_s21 = int_to_ptr.hbm [resolvable:$true] %s28_s21 }
   0x8   :  { %s30_s23 = sshll.u32 %s347_s22, 4  ;;  %s31_s23 = int_to_ptr.vmem [resolvable:$true] %s30_s23 }
   0x9   :  { %36 = dma.hbm_to_vmem [thread:$0]  %s29_s21, 128, %s31_s23, [#allocation6], %s345_s17, %s345_s17, %s346_s18  }
   0xa   :  { %40 = vsyncadd [#allocation6], 384  ;;  %s41_s25 = sshll.u32 %s384_s2, 4  ;;  %s348_s26 = smov [#allocation7]   ;;  %s42_s25 = int_to_ptr.hbm [resolvable:$true] %s41_s25 }
   0xb   :  { %s43_s27 = sshll.u32 %s348_s26, 4  ;;  %s44_s27 = int_to_ptr.vmem [resolvable:$true] %s43_s27 }
   0xc   :  { %49 = dma.hbm_to_vmem [thread:$0]  %s42_s25, 128, %s44_s27, [#allocation6], %s345_s17, %s345_s17, %s346_s18  }
   0xd   :  { %338 = dma.done.wait [#allocation3], 512  }
   0xe   :  { %339 = vsyncadd [#allocation3], 4294966784 }
   0xf   :  { %340 = dma.done.wait [#allocation6], 1024  }
  0x10   :  { %341 = vsyncadd [#allocation6], 4294966272  ;;  %v62_v0 = vld [vmem:[#allocation2] sm:$0xff]  ;;  %v196_v22 = vlaneseq  ;;  %s349_s1 = smov [#allocation8]   ;;  %s221_s30 = sshll.u32 %s385_s3, 4  ;;  %s222_s30 = int_to_ptr.hbm [resolvable:$true] %s221_s30 }
  0x11   :  { %v66_v1 = vld [vmem:[#allocation5] sm:$0xff]  ;;  %s219_s2 = sshll.u32 %s349_s1, 4  ;;  %s220_s2 = int_to_ptr.vmem [resolvable:$true] %s219_s2 }
  0x12   :  { %v74_v2 = vsub.f32 %v66_v1, %v62_v0  ;;  %v70_v25 = vld [vmem:[#allocation7] sm:$0xff]  ;;  %v197_v27 = vshrl.u32 %v196_v22, 7 }
  0x14   :  { %v78_v3 = vand.u32 2147483647, %v74_v2  ;;  %v138_v11 = vsub.f32 0.0, %v74_v2  ;;  %v130_v14 = vmax.f32 %v74_v2, 0.0  ;;  %vm202_vm1 = vcmp.lt.s32.totalorder %v197_v27, 7 }
  0x16   :  { %v82_v4 = vsub.f32 0.0, %v78_v3  ;;  %v142_v15 = vmax.f32 %v138_v11, 0.0 }
  0x18   :  { %v86_v5 = vmul.f32 1.442695, %v82_v4 }
  0x1a   :  { %238 = vpow2.f32 %v86_v5 }
  0x20   :  { %v239_v6 = vpop.eup %238 }
  0x21   :  { %v94_v7 = vadd.f32 1.0, %v239_v6  ;;  %v97_v8 = vmul.f32 -0.5, %v239_v6  ;;  %v100_v10 = vand.u32 2147483647, %v239_v6 }
  0x23   :  { %240 = vlog2.f32 %v94_v7  ;;  %v98_v9 = vadd.f32 1.0, %v97_v8  ;;  %vm101_vm0 = vcmp.lt.f32.partialorder %v100_v10, 0.0004427343 }
  0x25   :  { %v99_v12 = vmul.f32 %v239_v6, %v98_v9 }
  0x29   :  { %v241_v13 = vpop.eup %240 }
  0x2a   :  { %v96_v16 = vmul.f32 0.6931472, %v241_v13 }
  0x2c   :  { %v102_v17 = vsel %vm101_vm0, %v99_v12, %v96_v16 }
  0x2d   :  { %v134_v18 = vadd.f32 %v130_v14, %v102_v17  ;;  %v146_v19 = vadd.f32 %v142_v15, %v102_v17 }
  0x2f   :  { %v150_v20 = vsub.f32 0.0, %v146_v19  ;;  %v158_v21 = vsub.f32 0.0, %v134_v18 }
  0x31   :  { %v154_v23 = vmax.f32 %v150_v20, -100.0  ;;  %v162_v24 = vmax.f32 %v158_v21, -100.0 }
  0x33   :  { %v166_v26 = vsub.f32 %v154_v23, %v162_v24 }
  0x35   :  { %v170_v28 = vmul.f32 %v166_v26, %v70_v25 }
  0x37   :  { %v174_v29 = vadd.f32 %v170_v28, %v162_v24 }
  0x39   :  { %v178_v30 = vsub.f32 0.0, %v174_v29 }
  0x3b   :  { %v206_v31 = vsel %vm202_vm1, %v178_v30, 0.0 }
  0x3c   :  { %213 = vst [vmem:[#allocation8] sm:$0xff] %v206_v31 }
  0x3d   :  { %224 = dma.vmem_to_hbm [thread:$0]  %s220_s2, 128, %s222_s30, [#allocation4]  }
  0x3e   :  { %342 = dma.done.wait [#allocation4], 128  }
  0x3f   :  { %343 = vsyncadd [#allocation4], 4294967168 }
  0x40   :  { %229 = vsyncpa [#allocation3], 1 }
  0x41   :  { %230 = vsyncpa [#allocation6], 1 }
  0x42   :  { %231 = vsyncpa [#allocation4], 1 }

</bundles_post_ra>
